<compile_context>
chip_gen: v7x
topology: tpu7x:2x2x1
jax: 0.10.0
libtpu: 0.0.40
codegen_flags: <defaults>
</compile_context>

<pallas_src>
import functools

import jax
import jax.numpy as jnp
from jax.experimental import pallas as pl
from jax.experimental.pallas import tpu as pltpu

LANES = 128      # lane width; every fused stage is padded to this
ONE_LANE = 127   # constant-1 lane used to fold biases into the matmuls


# ---------------------------------------------------------------------------
# Pallas kernel: 4 fused, lane-dense, bias-free MXU passes for one modality.
# Grid axis 0 = modality (each block is one modality's padded x / weights).
# ---------------------------------------------------------------------------
def supra_kernel(x_ref, w1_ref, w2_ref, w3_ref, w4_ref, out_ref):
    x = x_ref[0]                                                      # [B, 128]
    y = jnp.maximum(jnp.dot(x, w1_ref[0], preferred_element_type=jnp.float32), 0.0)
    y = jnp.maximum(jnp.dot(y, w2_ref[0], preferred_element_type=jnp.float32), 0.0)
    y = jnp.maximum(jnp.dot(y, w3_ref[0], preferred_element_type=jnp.float32), 0.0)
    out = jnp.dot(y, w4_ref[0], preferred_element_type=jnp.float32)
    out_ref[0] = out.astype(out_ref.dtype)                            # [B, 128]


# ---------------------------------------------------------------------------
# Parameter construction (string-keyed nested dicts only — valid pytree).
# ---------------------------------------------------------------------------
def init_params(key, input_dims, shared_in_dim, hidden_dim, emo_out_dim, pkl_out_dim):
    def dense(k, fan_in, fan_out):
        kw, kb = jax.random.split(k)
        bound = 1.0 / float(fan_in) ** 0.5
        w = jax.random.uniform(kw, (fan_in, fan_out), jnp.float32, -bound, bound)
        b = jax.random.uniform(kb, (fan_out,), jnp.float32, -bound, bound)
        return {"w": w, "b": b}

    params = {"modality": {}, "shared": {}}
    keys = iter(jax.random.split(key, 4 * len(input_dims) + 3))
    for m in sorted(input_dims):
        d = input_dims[m]
        params["modality"][m] = {
            "proj": dense(next(keys), d, shared_in_dim),
            "aux1": dense(next(keys), d, hidden_dim),
            "aux2": dense(next(keys), hidden_dim, hidden_dim),
            "pkl":  dense(next(keys), hidden_dim, pkl_out_dim),
        }
    params["shared"] = {
        "sh1": dense(next(keys), shared_in_dim, hidden_dim),
        "sh2": dense(next(keys), hidden_dim, hidden_dim),
        "emo": dense(next(keys), hidden_dim, emo_out_dim),
    }
    return params


def build_fused_params(params, shared_in_dim, hidden_dim, emo_out_dim, pkl_out_dim):
    """Pack every modality's weights (+ biases, via the constant-1 lane) into
    four [128,128] block matrices and stack them along a modality axis."""
    S, H = shared_in_dim, hidden_dim
    assert S + H <= ONE_LANE, "projector + aux1 widths must fit below the 1-lane"
    assert 2 * H + emo_out_dim + pkl_out_dim <= ONE_LANE, "outputs must fit below the 1-lane"

    sh = params["shared"]
    eye_h = jnp.eye(H, dtype=jnp.float32)
    order = tuple(sorted(params["modality"]))
    w1s, w2s, w3s, w4s = [], [], [], []
    for m in order:
        p = params["modality"][m]
        d = p["proj"]["w"].shape[0]
        assert d <= ONE_LANE, "input dim must leave lane 127 free for the constant 1"

        # Stage 1: x_pad -> [x_proj | h_aux | 0 | 1]
        w1 = jnp.zeros((LANES, LANES), jnp.float32)
        w1 = w1.at[0:d, 0:S].set(p["proj"]["w"])
        w1 = w1.at[0:d, S:S + H].set(p["aux1"]["w"])
        w1 = w1.at[ONE_LANE, 0:S].set(p["proj"]["b"])
        w1 = w1.at[ONE_LANE, S:S + H].set(p["aux1"]["b"])
        w1 = w1.at[ONE_LANE, ONE_LANE].set(1.0)

        # Stage 2: -> [h_sh | z_aux | 0 | 1]
        w2 = jnp.zeros((LANES, LANES), jnp.float32)
        w2 = w2.at[0:S, 0:H].set(sh["sh1"]["w"])
        w2 = w2.at[S:S + H, H:2 * H].set(p["aux2"]["w"])
        w2 = w2.at[ONE_LANE, 0:H].set(sh["sh1"]["b"])
        w2 = w2.at[ONE_LANE, H:2 * H].set(p["aux2"]["b"])
        w2 = w2.at[ONE_LANE, ONE_LANE].set(1.0)

        # Stage 3: -> [z_emo | z_aux | 0 | 1]
        # (z_aux carried through identity; relu is exact on it since z_aux >= 0)
        w3 = jnp.zeros((LANES, LANES), jnp.float32)
        w3 = w3.at[0:H, 0:H].set(sh["sh2"]["w"])
        w3 = w3.at[H:2 * H, H:2 * H].set(eye_h)
        w3 = w3.at[ONE_LANE, 0:H].set(sh["sh2"]["b"])
        w3 = w3.at[ONE_LANE, ONE_LANE].set(1.0)

        # Stage 4 (no relu): -> [z_emo | z_aux | emo_logits | pkl_scores | 0]
        e0, e1 = 2 * H, 2 * H + emo_out_dim
        p0, p1 = e1, e1 + pkl_out_dim
        w4 = jnp.zeros((LANES, LANES), jnp.float32)
        w4 = w4.at[0:H, 0:H].set(eye_h)
        w4 = w4.at[H:2 * H, H:2 * H].set(eye_h)
        w4 = w4.at[0:H, e0:e1].set(sh["emo"]["w"])
        w4 = w4.at[H:2 * H, p0:p1].set(p["pkl"]["w"])
        w4 = w4.at[ONE_LANE, e0:e1].set(sh["emo"]["b"])
        w4 = w4.at[ONE_LANE, p0:p1].set(p["pkl"]["b"])

        w1s.append(w1); w2s.append(w2); w3s.append(w3); w4s.append(w4)

    return {
        "order": order,
        "w1": jnp.stack(w1s), "w2": jnp.stack(w2s),
        "w3": jnp.stack(w3s), "w4": jnp.stack(w4s),
    }


def pad_and_stack_inputs(x_dict, modalities):
    """Zero-pad each x to a lane-dense [B, 128] block with lane 127 == 1."""
    xs = []
    batch = None
    for m in modalities:
        x = jnp.asarray(x_dict[m], jnp.float32)
        b, d = x.shape
        assert d <= ONE_LANE
        assert batch is None or batch == b
        batch = b
        xp = jnp.zeros((b, LANES), jnp.float32)
        xp = xp.at[:, 0:d].set(x).at[:, ONE_LANE].set(1.0)
        xs.append(xp)
    return jnp.stack(xs, axis=0)                                      # [M, B, 128]


# ---------------------------------------------------------------------------
# Forward wrappers.
# ---------------------------------------------------------------------------
@functools.partial(jax.jit, static_argnames=("hidden_dim", "emo_out_dim", "pkl_out_dim"))
def _run_packed(x_pad, w1s, w2s, w3s, w4s, *, hidden_dim, emo_out_dim, pkl_out_dim):
    M, B, _ = x_pad.shape

    x_spec = pl.BlockSpec((1, B, LANES), lambda m: (m, 0, 0))
    w_spec = pl.BlockSpec((1, LANES, LANES), lambda m: (m, 0, 0))
    out_spec = pl.BlockSpec((1, B, LANES), lambda m: (m, 0, 0))

    flops = 2 * M * B * LANES * (4 * LANES)
    bytes_accessed = 4 * (2 * M * B * LANES + 4 * M * LANES * LANES)

    out = pl.pallas_call(
        supra_kernel,
        out_shape=jax.ShapeDtypeStruct((M, B, LANES), jnp.float32),
        grid=(M,),
        in_specs=[x_spec, w_spec, w_spec, w_spec, w_spec],
        out_specs=out_spec,
        compiler_params=pltpu.CompilerParams(dimension_semantics=("parallel",)),
        cost_estimate=pl.CostEstimate(
            flops=flops, transcendentals=0, bytes_accessed=bytes_accessed),
    )(x_pad, w1s, w2s, w3s, w4s)

    H = hidden_dim
    e0, e1 = 2 * H, 2 * H + emo_out_dim
    p0, p1 = e1, e1 + pkl_out_dim
    # Slices stay inside the jit so they fuse with the custom call.
    return {
        "z_emo": out[:, :, 0:H],
        "z_aux": out[:, :, H:2 * H],
        "emotion_logits": out[:, :, e0:e1],
        "personality_scores": out[:, :, p0:p1],
    }


def supra_forward_all(x_dict, fused_params, *, hidden_dim, emo_out_dim, pkl_out_dim):
    """Optimized path: all modalities in ONE pallas_call (grid over modality)."""
    order = fused_params["order"]
    x_pad = pad_and_stack_inputs(x_dict, order)
    packed = _run_packed(
        x_pad, fused_params["w1"], fused_params["w2"], fused_params["w3"],
        fused_params["w4"],
        hidden_dim=hidden_dim, emo_out_dim=emo_out_dim, pkl_out_dim=pkl_out_dim)
    return {m: {k: v[i] for k, v in packed.items()} for i, m in enumerate(order)}


def supra_forward(x_dict, fused_params, modality, *, hidden_dim, emo_out_dim, pkl_out_dim):
    """Original module semantics: process only the selected modality."""
    order = fused_params["order"]
    i = order.index(modality)
    x_pad = pad_and_stack_inputs({modality: x_dict[modality]}, (modality,))
    packed = _run_packed(
        x_pad,
        fused_params["w1"][i:i + 1], fused_params["w2"][i:i + 1],
        fused_params["w3"][i:i + 1], fused_params["w4"][i:i + 1],
        hidden_dim=hidden_dim, emo_out_dim=emo_out_dim, pkl_out_dim=pkl_out_dim)
    return {k: v[0] for k, v in packed.items()}


def supra_forward_ref(x_dict, params, modality):
    """Pure-JAX reference on the ORIGINAL (unfused) parameters."""
    hp = jax.lax.Precision.HIGHEST
    x = jnp.asarray(x_dict[modality], jnp.float32)
    relu = lambda v: jnp.maximum(v, 0.0)
    lin = lambda h, layer: jnp.dot(h, layer["w"], precision=hp) + layer["b"]

    p = params["modality"][modality]
    sh = params["shared"]
    x_proj = relu(lin(x, p["proj"]))
    z_emo = relu(lin(relu(lin(x_proj, sh["sh1"])), sh["sh2"]))
    z_aux = relu(lin(relu(lin(x, p["aux1"])), p["aux2"]))
    return {
        "z_emo": z_emo,
        "z_aux": z_aux,
        "emotion_logits": lin(z_emo, sh["emo"]),
        "personality_scores": lin(z_aux, p["pkl"]),
    }


if __name__ == "__main__":
    # Small shapes consistent with the module's forward.
    input_dims = {"audio": 32, "video": 48}
    shared_in_dim = 64
    hidden_dim = 32
    emo_out_dim = 7
    pkl_out_dim = 5
    batch = 8

    key = jax.random.PRNGKey(0)
    k_params, k_audio, k_video = jax.random.split(key, 3)

    params = init_params(
        k_params, input_dims, shared_in_dim, hidden_dim, emo_out_dim, pkl_out_dim)
    fused_params = build_fused_params(
        params, shared_in_dim, hidden_dim, emo_out_dim, pkl_out_dim)

    x_dict = {
        "audio": jax.random.normal(k_audio, (batch, input_dims["audio"]), jnp.float32),
        "video": jax.random.normal(k_video, (batch, input_dims["video"]), jnp.float32),
    }

    names = ("z_emo", "z_aux", "emotion_logits", "personality_scores")
    # Tolerance accommodates the MXU default-precision f32 matmul decomposition
    # vs. the Precision.HIGHEST reference; packing bugs would produce O(1) errors.
    TOL = 2e-2

    # Path 1: single fused call over all modalities (one launch).
    out_all = supra_forward_all(
        x_dict, fused_params,
        hidden_dim=hidden_dim, emo_out_dim=emo_out_dim, pkl_out_dim=pkl_out_dim)
    out_all = jax.tree_util.tree_map(jax.block_until_ready, out_all)

    for modality in ("audio", "video"):
        ref = supra_forward_ref(x_dict, params, modality)
        # Path 2: per-modality call (original forward semantics).
        out_one = supra_forward(
            x_dict, fused_params, modality,
            hidden_dim=hidden_dim, emo_out_dim=emo_out_dim, pkl_out_dim=pkl_out_dim)
        out_one = jax.tree_util.tree_map(jax.block_until_ready, out_one)
        for name in names:
            assert out_all[modality][name].shape == ref[name].shape, (modality, name)
            assert out_one[name].shape == ref[name].shape, (modality, name)
            assert jnp.allclose(out_all[modality][name], ref[name], atol=TOL, rtol=TOL), \
                ("fused-all", modality, name)
            assert jnp.allclose(out_one[name], ref[name], atol=TOL, rtol=TOL), \
                ("per-modality", modality, name)

    print("KERNEL_OK")
</pallas_src>

<mosaic_0001>
module attributes {stable_mosaic.version = 11 : i64} {
  func.func @supra_kernel(%arg0: i32, %arg1: memref<1x8x128xf32, #tpu.memory_space<vmem>>, %arg2: memref<1x128x128xf32, #tpu.memory_space<vmem>>, %arg3: memref<1x128x128xf32, #tpu.memory_space<vmem>>, %arg4: memref<1x128x128xf32, #tpu.memory_space<vmem>>, %arg5: memref<1x128x128xf32, #tpu.memory_space<vmem>>, %arg6: memref<1x8x128xf32, #tpu.memory_space<vmem>>) attributes {dimension_semantics = [#tpu.dimension_semantics<parallel>], iteration_bounds = array<i64: 2>, scalar_prefetch = 0 : i64, scratch_operands = 0 : i64, tpu.core_type = #tpu.core_type<tc>, window_params = [{transform_indices = @transform_0, window_bounds = array<i64: 1, 8, 128>}, {transform_indices = @transform_1, window_bounds = array<i64: 1, 128, 128>}, {transform_indices = @transform_2, window_bounds = array<i64: 1, 128, 128>}, {transform_indices = @transform_3, window_bounds = array<i64: 1, 128, 128>}, {transform_indices = @transform_4, window_bounds = array<i64: 1, 128, 128>}, {transform_indices = @transform_5, window_bounds = array<i64: 1, 8, 128>}]} {
    %c0 = arith.constant 0 : index
    %c0_0 = arith.constant 0 : index
    %c0_1 = arith.constant 0 : index
    %0 = vector.load %arg1[%c0, %c0_0, %c0_1] : memref<1x8x128xf32, #tpu.memory_space<vmem>>, vector<1x8x128xf32>
    %1 = vector.shape_cast %0 : vector<1x8x128xf32> to vector<8x128xf32>
    %c0_2 = arith.constant 0 : index
    %c0_3 = arith.constant 0 : index
    %c0_4 = arith.constant 0 : index
    %2 = vector.load %arg2[%c0_2, %c0_3, %c0_4] : memref<1x128x128xf32, #tpu.memory_space<vmem>>, vector<1x128x128xf32>
    %3 = vector.shape_cast %2 : vector<1x128x128xf32> to vector<128x128xf32>
    %cst = arith.constant dense<0.000000e+00> : vector<8x128xf32>
    %4 = tpu.matmul %1, %3, %cst {dimension_numbers = #tpu.dot_dimension_numbers<[1], [0], [0], [1], [0, 0, 1, 1], [], []>} : vector<8x128xf32>, vector<128x128xf32>, vector<8x128xf32> -> vector<8x128xf32>
    %cst_5 = arith.constant 0.000000e+00 : f32
    %5 = vector.broadcast %cst_5 : f32 to vector<8x128xf32>
    %6 = arith.maximumf %4, %5 : vector<8x128xf32>
    %c0_6 = arith.constant 0 : index
    %c0_7 = arith.constant 0 : index
    %c0_8 = arith.constant 0 : index
    %7 = vector.load %arg3[%c0_6, %c0_7, %c0_8] : memref<1x128x128xf32, #tpu.memory_space<vmem>>, vector<1x128x128xf32>
    %8 = vector.shape_cast %7 : vector<1x128x128xf32> to vector<128x128xf32>
    %cst_9 = arith.constant dense<0.000000e+00> : vector<8x128xf32>
    %9 = tpu.matmul %6, %8, %cst_9 {dimension_numbers = #tpu.dot_dimension_numbers<[1], [0], [0], [1], [0, 0, 1, 1], [], []>} : vector<8x128xf32>, vector<128x128xf32>, vector<8x128xf32> -> vector<8x128xf32>
    %cst_10 = arith.constant 0.000000e+00 : f32
    %10 = vector.broadcast %cst_10 : f32 to vector<8x128xf32>
    %11 = arith.maximumf %9, %10 : vector<8x128xf32>
    %c0_11 = arith.constant 0 : index
    %c0_12 = arith.constant 0 : index
    %c0_13 = arith.constant 0 : index
    %12 = vector.load %arg4[%c0_11, %c0_12, %c0_13] : memref<1x128x128xf32, #tpu.memory_space<vmem>>, vector<1x128x128xf32>
    %13 = vector.shape_cast %12 : vector<1x128x128xf32> to vector<128x128xf32>
    %cst_14 = arith.constant dense<0.000000e+00> : vector<8x128xf32>
    %14 = tpu.matmul %11, %13, %cst_14 {dimension_numbers = #tpu.dot_dimension_numbers<[1], [0], [0], [1], [0, 0, 1, 1], [], []>} : vector<8x128xf32>, vector<128x128xf32>, vector<8x128xf32> -> vector<8x128xf32>
    %cst_15 = arith.constant 0.000000e+00 : f32
    %15 = vector.broadcast %cst_15 : f32 to vector<8x128xf32>
    %16 = arith.maximumf %14, %15 : vector<8x128xf32>
    %c0_16 = arith.constant 0 : index
    %c0_17 = arith.constant 0 : index
    %c0_18 = arith.constant 0 : index
    %17 = vector.load %arg5[%c0_16, %c0_17, %c0_18] : memref<1x128x128xf32, #tpu.memory_space<vmem>>, vector<1x128x128xf32>
    %18 = vector.shape_cast %17 : vector<1x128x128xf32> to vector<128x128xf32>
    %cst_19 = arith.constant dense<0.000000e+00> : vector<8x128xf32>
    %19 = tpu.matmul %16, %18, %cst_19 {dimension_numbers = #tpu.dot_dimension_numbers<[1], [0], [0], [1], [0, 0, 1, 1], [], []>} : vector<8x128xf32>, vector<128x128xf32>, vector<8x128xf32> -> vector<8x128xf32>
    %c0_20 = arith.constant 0 : index
    %c0_21 = arith.constant 0 : index
    %c0_22 = arith.constant 0 : index
    %20 = vector.load %arg6[%c0_20, %c0_21, %c0_22] : memref<1x8x128xf32, #tpu.memory_space<vmem>>, vector<1x8x128xf32>
    %21 = vector.shape_cast %20 : vector<1x8x128xf32> to vector<8x128xf32>
    %22 = vector.shape_cast %19 : vector<8x128xf32> to vector<1x8x128xf32>
    tpu.vector_store %arg6[%c0_20, %c0_21, %c0_22], %22 {strides = array<i32>} : memref<1x8x128xf32, #tpu.memory_space<vmem>>, vector<1x8x128xf32>,
    return
  }
  func.func @transform_0(%arg0: i32) -> (i32, i32, i32) {
    %c0_i32 = arith.constant 0 : i32
    %c0_i32_0 = arith.constant 0 : i32
    %c0_i32_1 = arith.constant 0 : i32
    return %arg0, %c0_i32, %c0_i32_0 : i32, i32, i32
  }
  func.func @transform_1(%arg0: i32) -> (i32, i32, i32) {
    %c0_i32 = arith.constant 0 : i32
    %c0_i32_0 = arith.constant 0 : i32
    %c0_i32_1 = arith.constant 0 : i32
    return %arg0, %c0_i32, %c0_i32_0 : i32, i32, i32
  }
  func.func @transform_2(%arg0: i32) -> (i32, i32, i32) {
    %c0_i32 = arith.constant 0 : i32
    %c0_i32_0 = arith.constant 0 : i32
    %c0_i32_1 = arith.constant 0 : i32
    return %arg0, %c0_i32, %c0_i32_0 : i32, i32, i32
  }
  func.func @transform_3(%arg0: i32) -> (i32, i32, i32) {
    %c0_i32 = arith.constant 0 : i32
    %c0_i32_0 = arith.constant 0 : i32
    %c0_i32_1 = arith.constant 0 : i32
    return %arg0, %c0_i32, %c0_i32_0 : i32, i32, i32
  }
  func.func @transform_4(%arg0: i32) -> (i32, i32, i32) {
    %c0_i32 = arith.constant 0 : i32
    %c0_i32_0 = arith.constant 0 : i32
    %c0_i32_1 = arith.constant 0 : i32
    return %arg0, %c0_i32, %c0_i32_0 : i32, i32, i32
  }
  func.func @transform_5(%arg0: i32) -> (i32, i32, i32) {
    %c0_i32 = arith.constant 0 : i32
    %c0_i32_0 = arith.constant 0 : i32
    %c0_i32_1 = arith.constant 0 : i32
    return %arg0, %c0_i32, %c0_i32_0 : i32, i32, i32
  }
}

</mosaic_0001>

<bundles_post_ra>
// kernel: _run_packed.1
= control target key start
LH: loop header
LB: loop body
LE: loop exit
PB: predicated region body
PF: predicated region fallthrough
CT: control target
= control target key end

     0   :  { %s1918_s0 = inlined_call_operand.hbm [shape: f32[2,8,128], index: 0, kind: input, shape index: {}]   ;;  %s1919_s1 = inlined_call_operand.hbm [shape: f32[2,128,128], index: 1, kind: input, shape index: {}]   ;;  %s1920_s2 = inlined_call_operand.hbm [shape: f32[2,128,128], index: 2, kind: input, shape index: {}]   ;;  %s1921_s3 = inlined_call_operand.hbm [shape: f32[2,128,128], index: 3, kind: input, shape index: {}]   ;;  %s1922_s4 = inlined_call_operand.hbm [shape: f32[2,128,128], index: 4, kind: input, shape index: {}]   ;;  %s1923_s5 = inlined_call_operand.vmem [shape: f32[2,8,128], index: 5, kind: output, shape index: {}]  }
   0x1   :  { %1931 = sst [smem:[#allocation14_spill]] %s1919_s1 }
   0x2   :  { %1932 = sst [smem:[#allocation15_spill]] %s1921_s3 }
   0x3   :  { %10 = vsyncpa [#allocation3], 0 }
   0x4   :  { %12 = vsyncpa [#allocation3 + $0x1], 0 }
   0x5   :  { %13 = vsyncpa [#allocation5], 0 }
   0x6   :  { %15 = vsyncpa [#allocation5 + $0x1], 0 }
   0x7   :  { %16 = vsyncpa [#allocation8], 0 }
   0x8   :  { %18 = vsyncpa [#allocation8 + $0x1], 0  ;;  %s1526_s18 = smov 0   ;;  %s1528_s19 = smov 0  }
   0x9   :  { %s1530_s20 = smov 0   ;;  %s1532_s21 = smov 0  }
   0xa LB: > { %s1545_s22 = sadd.s32 4294967295, %s1484_s21   ;;  %s1548_s23 = sadd.s32 1, %s1484_s21   ;;  %s1484_s21 = sphi %s1532_s21, %s1949_s21   ;;  %s1480_s20 = sphi %s1530_s20, %s1948_s20   ;;  %s1476_s19 = sphi %s1528_s19, %s1947_s19   ;;  %s1472_s18 = sphi %s1526_s18, %s1946_s18  }
   0xb   : > { %s28_s24 = ssub.s32 %s1484_s21, %s1548_s23  ;;  %s31_s25 = sadd.s32 1, %s1480_s20 }
   0xc   : > { %p29_p0 = scmp.eq.s32.totalorder %s28_s24, 0  ;;  %p38_p1 = scmp.ne.s32.totalorder %s1480_s20, %s1476_s19 }
   0xd   : > { %p39_p2 = scmp.eq.s32.totalorder %s1484_s21, 0  ;;  %p44_p3 = scmp.ne.s32.totalorder %s1476_s19, %s1472_s18 }
   0xe   : > { %s1558_s26 = scalar_select %p29_p0, %s1480_s20, %s31_s25  }
   0xf   : > { %p40_p4 = por %p39_p2, %p38_p1  ;;  %p45_p5 = scmp.eq.s32.totalorder %s1545_s22, 0 }
  0x10   : > { %1933 = sst [smem:[#allocation13_spill]] %s1558_s26  ;;  %p1254_p6 = scmp.lt.s32.totalorder %s1484_s21, 2 }
  0x11   : > { %p1562_p7 = por %p45_p5, %p44_p3  ;;  %s1567_s28 = sand.u32 1, %s1480_s20  }
  0x12   : > { %p1569_p8 = pnand %p1254_p6, %p40_p4  ;;  %s216_s30 = sand.u32 1, %s1484_s21  }
  0x13   : > { %s1934_s27 = scalar_select %p1562_p7, 1, 0 }
  0x14   : > { %s1935_s29 = scalar_select %p1569_p8, 1, 0 }
  0x15   : > { %s1575_s6 = sshll.u32 %s1567_s28, 7  ;;  %s1578_s7 = sshll.u32 %s1484_s21, 11 }
  0x16   : > { %s220_s8 = scalar_lea.vmem [#allocation4], %s1575_s6  ;;  %s1936_s1 = sld [smem:[#allocation14_spill]] }
  0x17   : > { %s227_s9 = sshll.u32 %s220_s8, 4  ;;  %s1591_s13 = scalar_lea.sflag [#allocation5], %s216_s30  ;;  %s1587_s9 = int_to_ptr.vmem [resolvable:$true] %s227_s9 }
  0x18   : > { %p1597_p10 = pneg %p1569_p8 }
  0x1c   : > { %s1585_s12 = scalar_lea.hbm %s1936_s1, %s1578_s7  ;;  %s1297_s18 = scalar_lea.hbm %s1936_s1, 4096 }
  0x1d   : > { %s1292_s14 = scalar_lea.hbm %s1585_s12, 2048  ;;  %p1298_p13 = scmp.lt.u32.totalorder %s1585_s12, %s1936_s1 }
  0x1e   : > { %p1293_p9 = scmp.ne.s32.totalorder %s1585_s12, %s1292_s14  ;;  %p1299_p0 = scmp.lt.u32.totalorder %s1297_s18, %s1292_s14 }
  0x1f   : > { %p1301_p2 = scmp.lt.u32.totalorder %s1292_s14, %s1585_s12 }
  0x20   : > { %p1295_p11 = pnand %p1597_p10, %p1293_p9  ;;  %p1300_p1 = por %p1299_p0, %p1298_p13 }
  0x22   : > { %p1296_p12 = pneg %p1295_p11  ;;  %p1302_p3 = por %p1301_p2, %p1300_p1 }
  0x24   : > { %p1303_p4 = pnand %p1302_p3, %p1296_p12 }
  0x26   : > { %1306 = shalt.err (!%p1303_p4)
}
  0x27   : > { %s1307_s8 = scalar_lea.vmem %s1587_s9, 2048  ;;  %s1486_s10 = smov [#allocation4]  }
  0x28   : > { %p1308_p5 = scmp.ne.s32.totalorder %s1587_s9, %s1307_s8  ;;  %s1312_s11 = sshll.u32 %s1486_s10, 4  ;;  %s1313_s11 = int_to_ptr.vmem [resolvable:$false] %s1312_s11 }
  0x29   : > { %s1314_s16 = scalar_lea.vmem %s1313_s11, 4096  ;;  %p1315_p11 = scmp.lt.s32.totalorder %s1587_s9, %s1313_s11 }
  0x2a   : > { %p1310_p6 = pnand %p1308_p5, %p1597_p10  ;;  %p1316_p7 = scmp.lt.s32.totalorder %s1314_s16, %s1307_s8 }
  0x2c   : > { %p1311_p9 = pneg %p1310_p6  ;;  %p1317_p13 = por %p1316_p7, %p1315_p11 }
  0x2e   : > { %p1318_p0 = pnand %p1317_p13, %p1311_p9 }
  0x30   : > { %1321 = shalt.err (!%p1318_p0)
}
  0x31   : > { %s1925_s14 = smov 128   ;;  %s1927_s17 = smov 8  }
  0x32   : > { %1244 = dma.hbm_to_vmem [thread:$0]  (!%p1569_p8), %s1585_s12, 2048, %s1587_s9, %s1591_s13, %s1925_s14, %s1925_s14, %s1927_s17  }
  0x33   : > { %p911_p7 = scmp.ge.s32.totalorder %s1484_s21, 1  ;;  %p298_p12 = scmp.lt.s32.totalorder %s1484_s21, 3 }
  0x34   : > { %s1939_s3 = sld [smem:[#allocation15_spill]]  ;;  %s262_s10 = scalar_lea.vmem [#allocation7], %s1575_s6 }
  0x35   : > { %p1626_p1 = pnand %p911_p7, %p298_p12  ;;  %s269_s11 = sshll.u32 %s262_s10, 4  ;;  %s1637_s11 = int_to_ptr.vmem [resolvable:$true] %s269_s11 }
  0x36   : > { %s897_s9 = sshll.u32 %s1567_s28, 3  ;;  %s1642_s12 = scalar_lea.sflag [#allocation8], %s216_s30 }
  0x37   : > { %s1938_s18 = scalar_select %p1626_p1, 1, 0 }
  0x3a   : > { %s1634_s8 = scalar_lea.hbm %s1939_s3, %s1578_s7  ;;  %s1327_s14 = scalar_lea.hbm %s1939_s3, 4096 }
  0x3b   : > { %s1322_s16 = scalar_lea.hbm %s1634_s8, 2048  ;;  %p1328_p5 = scmp.lt.u32.totalorder %s1634_s8, %s1939_s3 }
  0x3c   : > { %p1323_p2 = scmp.ne.s32.totalorder %s1634_s8, %s1322_s16  ;;  %p1329_p6 = scmp.lt.u32.totalorder %s1327_s14, %s1322_s16 }
  0x3d   : > { %p1331_p11 = scmp.lt.u32.totalorder %s1322_s16, %s1634_s8 }
  0x3e   : > { %p1325_p3 = pnand %p1323_p2, %p1597_p10  ;;  %p1330_p9 = por %p1329_p6, %p1328_p5 }
  0x40   : > { %p1326_p4 = pneg %p1325_p3  ;;  %p1332_p13 = por %p1331_p11, %p1330_p9 }
  0x42   : > { %p1333_p0 = pnand %p1332_p13, %p1326_p4 }
  0x44   : > { %1336 = shalt.err (!%p1333_p0)
}
  0x45   : > { %s1337_s30 = scalar_lea.vmem %s1637_s11, 2048  ;;  %s1489_s10 = smov [#allocation7]  }
  0x46   : > { %p1338_p7 = scmp.ne.s32.totalorder %s1637_s11, %s1337_s30  ;;  %s1342_s24 = sshll.u32 %s1489_s10, 4  ;;  %s1343_s24 = int_to_ptr.vmem [resolvable:$false] %s1342_s24 }
  0x47   : > { %s1344_s1 = scalar_lea.vmem %s1343_s24, 4096  ;;  %p1345_p3 = scmp.lt.s32.totalorder %s1637_s11, %s1343_s24 }
  0x48   : > { %p1340_p12 = pnand %p1338_p7, %p1597_p10  ;;  %p1346_p1 = scmp.lt.s32.totalorder %s1344_s1, %s1337_s30 }
  0x4a   : > { %p1341_p2 = pneg %p1340_p12  ;;  %p1347_p5 = por %p1346_p1, %p1345_p3 }
  0x4c   : > { %p1348_p6 = pnand %p1347_p5, %p1341_p2 }
  0x4e   : > { %1351 = shalt.err (!%p1348_p6)
}
  0x4f   : > { %s1940_s14 = smov 8   ;;  %s1941_s17 = smov 128  }
  0x50   : > { %1250 = dma.hbm_to_vmem [thread:$0]  (!%p1569_p8), %s1634_s8, 2048, %s1637_s11, %s1642_s12, %s1941_s17, %s1941_s17, %s1940_s14  }
  0x51   : > { %s898_s16 = sshll.u32 %s1484_s21, 7  ;;  %s202_s24 = scalar_lea.vmem [#allocation2], %s897_s9 }
  0x52   : > { %s1673_s30 = scalar_lea.hbm %s1918_s0, %s898_s16  ;;  %s209_s1 = sshll.u32 %s202_s24, 4  ;;  %s210_s1 = int_to_ptr.vmem [resolvable:$true] %s209_s1 }
  0x53   : > { %s199_s3 = scalar_lea.sflag [#allocation3], %s1567_s28  ;;  %s1352_s26 = scalar_lea.hbm %s1673_s30, 128 }
  0x54   : > { %p1353_p1 = scmp.ne.s32.totalorder %s1673_s30, %s1352_s26  ;;  %s1357_s11 = scalar_lea.hbm %s1918_s0, 256 }
  0x55   : > { %p1358_p11 = scmp.lt.u32.totalorder %s1673_s30, %s1918_s0  ;;  %p1359_p13 = scmp.lt.u32.totalorder %s1357_s11, %s1352_s26 }
  0x56   : > { %p1355_p4 = pnand %p1353_p1, %p1597_p10  ;;  %p1361_p7 = scmp.lt.u32.totalorder %s1352_s26, %s1673_s30 }
  0x57   : > { %p1360_p0 = por %p1359_p13, %p1358_p11 }
  0x58   : > { %p1356_p9 = pneg %p1355_p4 }
  0x59   : > { %p1362_p12 = por %p1361_p7, %p1360_p0 }
  0x5b   : > { %p1363_p2 = pnand %p1362_p12, %p1356_p9 }
  0x5d   : > { %1366 = shalt.err (!%p1363_p2)
}
  0x5e   : > { %s1367_s28 = scalar_lea.vmem %s210_s1, 128  ;;  %s1490_s9 = smov [#allocation2]  }
  0x5f   : > { %p1368_p3 = scmp.ne.s32.totalorder %s210_s1, %s1367_s28  ;;  %s1372_s10 = sshll.u32 %s1490_s9, 4  ;;  %s1373_s10 = int_to_ptr.vmem [resolvable:$false] %s1372_s10 }
  0x60   : > { %s1374_s24 = scalar_lea.vmem %s1373_s10, 256  ;;  %p1375_p1 = scmp.lt.s32.totalorder %s210_s1, %s1373_s10 }
  0x61   : > { %p1370_p5 = pnand %p1368_p3, %p1597_p10  ;;  %p1376_p4 = scmp.lt.s32.totalorder %s1374_s24, %s1367_s28 }
  0x63   : > { %p1371_p6 = pneg %p1370_p5  ;;  %p1377_p8 = por %p1376_p4, %p1375_p1 }
  0x65   : > { %p1378_p11 = pnand %p1377_p8, %p1371_p6 }
  0x67   : > { %1381 = shalt.err (!%p1378_p11)
}
  0x68   : > { %p1942_p13 = scmp.ne.s32.totalorder %s1935_s29, 0  ;;  %s1699_s8 = scalar_lea.hbm %s1920_s2, %s1578_s7 }
  0x69   : > { %s241_s11 = scalar_lea.vmem [#allocation6], %s1575_s6  ;;  %s1382_s25 = scalar_lea.hbm %s1699_s8, 2048 }
  0x6a   : > { %1241 = dma.hbm_to_vmem [thread:$0]  (!%p1942_p13), %s1673_s30, 128, %s210_s1, %s199_s3  }
  0x6b   : > { %s248_s16 = sshll.u32 %s241_s11, 4  ;;  %p1383_p8 = scmp.ne.s32.totalorder %s1699_s8, %s1382_s25  ;;  %s1702_s16 = int_to_ptr.vmem [resolvable:$true] %s248_s16 }
  0x6c   : > { %s1387_s30 = scalar_lea.hbm %s1920_s2, 4096  ;;  %p1388_p7 = scmp.lt.u32.totalorder %s1699_s8, %s1920_s2 }
  0x6d   : > { %p1385_p9 = pnand %p1383_p8, %p1597_p10  ;;  %p1389_p12 = scmp.lt.u32.totalorder %s1387_s30, %s1382_s25 }
  0x6e   : > { %p1391_p3 = scmp.lt.u32.totalorder %s1382_s25, %s1699_s8 }
  0x6f   : > { %p1386_p0 = pneg %p1385_p9  ;;  %p1390_p2 = por %p1389_p12, %p1388_p7 }
  0x71   : > { %p1392_p5 = por %p1391_p3, %p1390_p2 }
  0x73   : > { %p1393_p6 = pnand %p1392_p5, %p1386_p0 }
  0x75   : > { %1396 = shalt.err (!%p1393_p6)
}
  0x76   : > { %s1397_s10 = scalar_lea.vmem %s1702_s16, 2048  ;;  %s1491_s24 = smov [#allocation6]  }
  0x77   : > { %p1398_p1 = scmp.ne.s32.totalorder %s1702_s16, %s1397_s10  ;;  %s1402_s26 = sshll.u32 %s1491_s24, 4  ;;  %s1403_s26 = int_to_ptr.vmem [resolvable:$false] %s1402_s26 }
  0x78   : > { %s1404_s21 = scalar_lea.vmem %s1403_s26, 4096  ;;  %p1405_p8 = scmp.lt.s32.totalorder %s1702_s16, %s1403_s26 }
  0x79   : > { %p1400_p4 = pnand %p1398_p1, %p1597_p10  ;;  %p1406_p9 = scmp.lt.s32.totalorder %s1404_s21, %s1397_s10 }
  0x7b   : > { %p1401_p11 = pneg %p1400_p4  ;;  %p1407_p7 = por %p1406_p9, %p1405_p8 }
  0x7d   : > { %p1408_p12 = pnand %p1407_p7, %p1401_p11 }
  0x7f   : > { %1411 = shalt.err (!%p1408_p12)
}
  0x80   : > { %1247 = dma.hbm_to_vmem [thread:$0]  (!%p1942_p13), %s1699_s8, 2048, %s1702_s16, %s1591_s13, %s1941_s17, %s1941_s17, %s1940_s14  }
  0x81   : > { %s1733_s28 = scalar_lea.hbm %s1922_s4, %s1578_s7  ;;  %s283_s3 = scalar_lea.vmem [#allocation9], %s1575_s6 }
  0x82   : > { %s290_s30 = sshll.u32 %s283_s3, 4  ;;  %s1412_s1 = scalar_lea.hbm %s1733_s28, 2048  ;;  %s1736_s30 = int_to_ptr.vmem [resolvable:$true] %s290_s30 }
  0x83   : > { %p1413_p0 = scmp.ne.s32.totalorder %s1733_s28, %s1412_s1  ;;  %s1417_s8 = scalar_lea.hbm %s1922_s4, 4096 }
  0x84   : > { %p1418_p5 = scmp.lt.u32.totalorder %s1733_s28, %s1922_s4  ;;  %p1419_p6 = scmp.lt.u32.totalorder %s1417_s8, %s1412_s1 }
  0x85   : > { %p1415_p2 = pnand %p1413_p0, %p1597_p10  ;;  %p1421_p4 = scmp.lt.u32.totalorder %s1412_s1, %s1733_s28 }
  0x86   : > { %p1420_p1 = por %p1419_p6, %p1418_p5 }
  0x87   : > { %p1416_p3 = pneg %p1415_p2 }
  0x88   : > { %p1422_p11 = por %p1421_p4, %p1420_p1 }
  0x8a   : > { %p1423_p8 = pnand %p1422_p11, %p1416_p3 }
  0x8c   : > { %1426 = shalt.err (!%p1423_p8)
}
  0x8d   : > { %s1427_s6 = scalar_lea.vmem %s1736_s30, 2048  ;;  %s1492_s10 = smov [#allocation9]  }
  0x8e   : > { %p1428_p9 = scmp.ne.s32.totalorder %s1736_s30, %s1427_s6  ;;  %s1432_s24 = sshll.u32 %s1492_s10, 4  ;;  %s1433_s24 = int_to_ptr.vmem [resolvable:$false] %s1432_s24 }
  0x8f   : > { %s1434_s26 = scalar_lea.vmem %s1433_s24, 4096  ;;  %p1435_p0 = scmp.lt.s32.totalorder %s1736_s30, %s1433_s24 }
  0x90   : > { %p1430_p7 = pnand %p1428_p9, %p1597_p10  ;;  %p1436_p2 = scmp.lt.s32.totalorder %s1434_s26, %s1427_s6 }
  0x92   : > { %p1431_p12 = pneg %p1430_p7  ;;  %p1437_p5 = por %p1436_p2, %p1435_p0 }
  0x94   : > { %p1438_p6 = pnand %p1437_p5, %p1431_p12 }
  0x96   : > { %1441 = shalt.err (!%p1438_p6)
}
  0x97   : > { %1253 = dma.hbm_to_vmem [thread:$0]  (!%p1942_p13), %s1733_s28, 2048, %s1736_s30, %s1642_s12, %s1941_s17, %s1941_s17, %s1940_s14  }
  0x98   : > { %p1943_p10 = scmp.ne.s32.totalorder %s1938_s18, 0 }
  0x99   : > { %s304_s15 = sand.u32 (!%p1943_p10), 1, %s1476_s19   ;;  %p1944_p3 = scmp.ne.s32.totalorder (!%p1943_p10), %s1934_s27, 0 }
  0x9a   : > { %302 = sbr.rel (%p1943_p10) target bundleno = 1057 (0x421), region = 40  ;;  %s912_s21 = sshll.u32 (!%p1943_p10), %s304_s15, 3 }
  0x9b   : > { %s305_s11 = scalar_lea.sflag (!%p1943_p10), [#allocation3], %s304_s15  ;;  %s1766_s25 = scalar_lea.vmem (!%p1943_p10), [#allocation2], %s912_s21 }
  0xa1   : > { %1459 = dma.done.wait (%p1944_p3), %s305_s11, 128  }
  0xa2   : > { %1461 = vsyncadd (%p1944_p3), %s305_s11, 4294967168  ;;  %s313_s29 = sand.u32 1, %s1545_s22   ;;  %s1773_s3 = sshll.u32 %s304_s15, 7 }
  0xa3   : > { %s314_s18 = scalar_lea.sflag [#allocation5], %s313_s29  ;;  %s1776_s12 = scalar_lea.vmem [#allocation4], %s1773_s3 }
  0xa4   : > { %1463 = dma.done.wait (%p1944_p3), %s314_s18, 4096  }
  0xa5   : > { %1465 = vsyncadd (%p1944_p3), %s314_s18, 4294963200  ;;  %s1783_s14 = scalar_lea.vmem [#allocation6], %s1773_s3  ;;  %s332_s17 = scalar_lea.sflag [#allocation8], %s313_s29 }
  0xa6   : > { %s1786_s28 = scalar_lea.vmem [#allocation7], %s1773_s3 }
  0xa7   : > { %1467 = dma.done.wait (%p1944_p3), %s332_s17, 4096  }
  0xa8   : > { %1469 = vsyncadd (%p1944_p3), %s332_s17, 4294963200  ;;  %v1493_v0 = vmov 0.0|0.0   ;;  %vm1494_vm0 = vmmov 0   ;;  %v1495_v1 = vmov 0.0   ;;  %v395_v2 = vld [vmem:[%s1776_s12] sm:$0xff]  ;;  %v396_v3 = vld [vmem:[%s1776_s12 + $0x8] sm:$0xff] }
  0xa9   : > { %1132 = vmatprep.subr.bf16.mxu0 %v1493_v0  ;;  %1024 = vmatprep.mubr.msk.f32.mxu0 %vm1494_vm0, %v1495_v1  ;;  %v397_v4 = vld [vmem:[%s1776_s12 + $0x10] sm:$0xff]  ;;  %v1133_v5 = vpack.c.bf16 %v396_v3, %v395_v2  ;;  %v398_v6 = vld [vmem:[%s1776_s12 + $0x18] sm:$0xff]  ;;  %v399_v8 = vld [vmem:[%s1776_s12 + $0x20] sm:$0xff]  ;;  %s1875_s27 = scalar_lea.vmem [#allocation9], %s1773_s3  ;;  %p390_p13 = scmp.lt.s32.totalorder %s1545_s22, 1 }
  0xaa   : > { %1156 = vmatprep.subr.bf16.mxu1 %v1493_v0  ;;  %1059 = vmatprep.mubr.msk.f32.mxu1 %vm1494_vm0, %v1495_v1  ;;  %v1136_v7 = vpack.c.bf16 %v398_v6, %v397_v4  ;;  %v400_v9 = vld [vmem:[%s1776_s12 + $0x28] sm:$0xff]  ;;  %v482_v10 = vld [vmem:[%s1783_s14] sm:$0xff]  ;;  %v484_v12 = vld [vmem:[%s1783_s14 + $0x10] sm:$0xff] }
  0xab   : > { %1134 = vmatpush3.bf16.msra.mxu0 %v1133_v5  ;;  %v483_v11 = vld [vmem:[%s1783_s14 + $0x8] sm:$0xff]  ;;  %v485_v13 = vld [vmem:[%s1783_s14 + $0x18] sm:$0xff]  ;;  %v1139_v14 = vpack.c.bf16 %v400_v9, %v399_v8  ;;  %v401_v16 = vld [vmem:[%s1776_s12 + $0x30] sm:$0xff]  ;;  %s1951_s22 = smov (!%p390_p13, %s1545_s22), 1 }
  0xac   : > { %1135 = vmatprep.subr.bf16.mxu0 %v1493_v0  ;;  %v1157_v15 = vpack.c.bf16 %v483_v11, %v482_v10  ;;  %v402_v17 = vld [vmem:[%s1776_s12 + $0x38] sm:$0xff]  ;;  %v1160_v18 = vpack.c.bf16 %v485_v13, %v484_v12  ;;  %v486_v19 = vld [vmem:[%s1783_s14 + $0x20] sm:$0xff]  ;;  %v487_v20 = vld [vmem:[%s1783_s14 + $0x28] sm:$0xff]  ;;  %s917_s30 = sshll.u32 %s1951_s22, 3 }
  0xad   : > { %v1142_v21 = vpack.c.bf16 %v402_v17, %v401_v16  ;;  %v403_v22 = vld [vmem:[%s1776_s12 + $0x40] sm:$0xff]  ;;  %v404_v23 = vld [vmem:[%s1776_s12 + $0x48] sm:$0xff]  ;;  %v1163_v24 = vpack.c.bf16 %v487_v20, %v486_v19  ;;  %v488_v25 = vld [vmem:[%s1783_s14 + $0x30] sm:$0xff]  ;;  %s393_s13 = scalar_lea.vmem %s1923_s5, %s917_s30 }
  0xae   : > { %1158 = vmatpush3.bf16.msra.mxu1 %v1157_v15  ;;  %v489_v26 = vld [vmem:[%s1783_s14 + $0x38] sm:$0xff]  ;;  %v1145_v27 = vpack.c.bf16 %v404_v23, %v403_v22  ;;  %v405_v28 = vld [vmem:[%s1776_s12 + $0x50] sm:$0xff]  ;;  %v490_v31 = vld [vmem:[%s1783_s14 + $0x40] sm:$0xff] }
  0xaf   : > { %1137 = vmatpush3.bf16.msra.mxu0 %v1136_v7  ;;  %1159 = vmatprep.subr.bf16.mxu1 %v1493_v0  ;;  %v406_v29 = vld [vmem:[%s1776_s12 + $0x58] sm:$0xff]  ;;  %v1166_v30 = vpack.c.bf16 %v489_v26, %v488_v25  ;;  %v491_v32 = vld [vmem:[%s1783_s14 + $0x48] sm:$0xff]  ;;  %v407_v34 = vld [vmem:[%s1776_s12 + $0x60] sm:$0xff] }
  0xb0   : > { %1138 = vmatprep.subr.bf16.mxu0 %v1493_v0  ;;  %v1148_v33 = vpack.c.bf16 %v406_v29, %v405_v28  ;;  %v408_v35 = vld [vmem:[%s1776_s12 + $0x68] sm:$0xff]  ;;  %v1169_v36 = vpack.c.bf16 %v491_v32, %v490_v31  ;;  %v492_v37 = vld [vmem:[%s1783_s14 + $0x50] sm:$0xff]  ;;  %v493_v38 = vld [vmem:[%s1783_s14 + $0x58] sm:$0xff] }
  0xb1   : > { %v1151_v39 = vpack.c.bf16 %v408_v35, %v407_v34  ;;  %v409_v40 = vld [vmem:[%s1776_s12 + $0x70] sm:$0xff]  ;;  %v410_v41 = vld [vmem:[%s1776_s12 + $0x78] sm:$0xff]  ;;  %v1172_v42 = vpack.c.bf16 %v493_v38, %v492_v37  ;;  %v494_v43 = vld [vmem:[%s1783_s14 + $0x60] sm:$0xff] }
  0xb2   : > { %1161 = vmatpush3.bf16.msra.mxu1 %v1160_v18  ;;  %v495_v44 = vld [vmem:[%s1783_s14 + $0x68] sm:$0xff]  ;;  %v1154_v45 = vpack.c.bf16 %v410_v41, %v409_v40  ;;  %v394_v47 = vld [vmem:[%s1766_s25] sm:$0xff]  ;;  %v569_v51 = vld [vmem:[%s1786_s28] sm:$0xff] }
  0xb3   : > { %1140 = vmatpush3.bf16.msra.mxu0 %v1139_v14  ;;  %1162 = vmatprep.subr.bf16.mxu1 %v1493_v0  ;;  %v1175_v46 = vpack.c.bf16 %v495_v44, %v494_v43  ;;  %v496_v48 = vld [vmem:[%s1783_s14 + $0x70] sm:$0xff]  ;;  %v497_v49 = vld [vmem:[%s1783_s14 + $0x78] sm:$0xff]  ;;  %v570_v52 = vld [vmem:[%s1786_s28 + $0x8] sm:$0xff] }
  0xb4   : > { %1141 = vmatprep.subr.bf16.mxu0 %v1493_v0  ;;  %v1178_v50 = vpack.c.bf16 %v497_v49, %v496_v48  ;;  %v571_v53 = vld [vmem:[%s1786_s28 + $0x10] sm:$0xff]  ;;  %v1181_v54 = vpack.c.bf16 %v570_v52, %v569_v51  ;;  %v572_v55 = vld [vmem:[%s1786_s28 + $0x18] sm:$0xff]  ;;  %v573_v57 = vld [vmem:[%s1786_s28 + $0x20] sm:$0xff] }
  0xb5   : > { %v1184_v56 = vpack.c.bf16 %v572_v55, %v571_v53  ;;  %v574_v58 = vld [vmem:[%s1786_s28 + $0x28] sm:$0xff]  ;;  %v575_v60 = vld [vmem:[%s1786_s28 + $0x30] sm:$0xff]  ;;  %v576_v61 = vld [vmem:[%s1786_s28 + $0x38] sm:$0xff] }
  0xb6   : > { %1164 = vmatpush3.bf16.msra.mxu1 %v1163_v24  ;;  %v1187_v59 = vpack.c.bf16 %v574_v58, %v573_v57  ;;  %v1190_v62 = vpack.c.bf16 %v576_v61, %v575_v60  ;;  %v577_v63 = vld [vmem:[%s1786_s28 + $0x40] sm:$0xff]  ;;  %v578_v2 = vld [vmem:[%s1786_s28 + $0x48] sm:$0xff]  ;;  %v579_v4 = vld [vmem:[%s1786_s28 + $0x50] sm:$0xff] }
  0xb7   : > { %1143 = vmatpush3.bf16.msra.mxu0 %v1142_v21  ;;  %1165 = vmatprep.subr.bf16.mxu1 %v1493_v0  ;;  %v1193_v3 = vpack.c.bf16 %v578_v2, %v577_v63  ;;  %v580_v5 = vld [vmem:[%s1786_s28 + $0x58] sm:$0xff]  ;;  %v581_v7 = vld [vmem:[%s1786_s28 + $0x60] sm:$0xff]  ;;  %v582_v8 = vld [vmem:[%s1786_s28 + $0x68] sm:$0xff] }
  0xb8   : > { %1144 = vmatprep.subr.bf16.mxu0 %v1493_v0  ;;  %v1196_v6 = vpack.c.bf16 %v580_v5, %v579_v4  ;;  %v1199_v9 = vpack.c.bf16 %v582_v8, %v581_v7  ;;  %v583_v13 = vld [vmem:[%s1786_s28 + $0x70] sm:$0xff]  ;;  %v584_v14 = vld [vmem:[%s1786_s28 + $0x78] sm:$0xff]  ;;  %v656_v16 = vld [vmem:[%s1875_s27] sm:$0xff] }
  0xb9   : > { %v1202_v15 = vpack.c.bf16 %v584_v14, %v583_v13  ;;  %v657_v17 = vld [vmem:[%s1875_s27 + $0x8] sm:$0xff]  ;;  %v658_v18 = vld [vmem:[%s1875_s27 + $0x10] sm:$0xff]  ;;  %v660_v21 = vld [vmem:[%s1875_s27 + $0x20] sm:$0xff] }
  0xba   : > { %1167 = vmatpush3.bf16.msra.mxu1 %v1166_v30  ;;  %v1205_v19 = vpack.c.bf16 %v657_v17, %v656_v16  ;;  %v661_v22 = vld [vmem:[%s1875_s27 + $0x28] sm:$0xff]  ;;  %v662_v24 = vld [vmem:[%s1875_s27 + $0x30] sm:$0xff]  ;;  %v663_v25 = vld [vmem:[%s1875_s27 + $0x38] sm:$0xff] }
  0xbb   : > { %1146 = vmatpush3.bf16.msra.mxu0 %v1145_v27  ;;  %1168 = vmatprep.subr.bf16.mxu1 %v1493_v0  ;;  %v1211_v23 = vpack.c.bf16 %v661_v22, %v660_v21  ;;  %v1214_v26 = vpack.c.bf16 %v663_v25, %v662_v24  ;;  %v664_v27 = vld [vmem:[%s1875_s27 + $0x40] sm:$0xff]  ;;  %v665_v28 = vld [vmem:[%s1875_s27 + $0x48] sm:$0xff]  ;;  %v666_v30 = vld [vmem:[%s1875_s27 + $0x50] sm:$0xff] }
  0xbc   : > { %1147 = vmatprep.subr.bf16.mxu0 %v1493_v0  ;;  %v1217_v29 = vpack.c.bf16 %v665_v28, %v664_v27  ;;  %v667_v31 = vld [vmem:[%s1875_s27 + $0x58] sm:$0xff]  ;;  %v669_v34 = vld [vmem:[%s1875_s27 + $0x68] sm:$0xff] }
  0xbd   : > { %v1220_v32 = vpack.c.bf16 %v667_v31, %v666_v30  ;;  %v671_v40 = vld [vmem:[%s1875_s27 + $0x78] sm:$0xff] }
  0xbe   : > { %1170 = vmatpush3.bf16.msra.mxu1 %v1169_v36 }
  0xbf   : > { %1149 = vmatpush3.bf16.msra.mxu0 %v1148_v33  ;;  %1171 = vmatprep.subr.bf16.mxu1 %v1493_v0  ;;  %v668_v33 = vld [vmem:[%s1875_s27 + $0x60] sm:$0xff] }
  0xc0   : > { %1150 = vmatprep.subr.bf16.mxu0 %v1493_v0  ;;  %v1223_v35 = vpack.c.bf16 %v669_v34, %v668_v33 }
  0xc2   : > { %1173 = vmatpush3.bf16.msra.mxu1 %v1172_v42 }
  0xc3   : > { %1152 = vmatpush3.bf16.msra.mxu0 %v1151_v39  ;;  %1174 = vmatprep.subr.bf16.mxu1 %v1493_v0  ;;  %v670_v39 = vld [vmem:[%s1875_s27 + $0x70] sm:$0xff] }
  0xc4   : > { %1153 = vmatprep.subr.bf16.mxu0 %v1493_v0  ;;  %v1226_v41 = vpack.c.bf16 %v671_v40, %v670_v39 }
  0xc6   : > { %1176 = vmatpush3.bf16.msra.mxu1 %v1175_v46 }
  0xc7   : > { %1155 = vmatpush3.bf16.msra.mxu0 %v1154_v45  ;;  %1177 = vmatprep.subr.bf16.mxu1 %v1493_v0 }
  0xc8   : > { %1180 = vmatprep.subr.bf16.mxu0 %v1493_v0 }
  0xca   : > { %1025 = vmatmul.mubr.f32.vlgmr.msra.gmra.mrb[0].mxu0 %v394_v47  ;;  %1179 = vmatpush3.bf16.msra.mxu1 %v1178_v50 }
  0xcb   : > { %1094 = vmatprep.mubr.msk.f32.mxu0 %vm1494_vm0, %v1495_v1  ;;  %1204 = vmatprep.subr.bf16.mxu1 %v1493_v0 }
  0xcc   : > { %1182 = vmatpush3.bf16.msra.mxu0 %v1181_v54 }
  0xcd   : > { %1183 = vmatprep.subr.bf16.mxu0 %v1493_v0 }
  0xd0   : > { %1185 = vmatpush3.bf16.msra.mxu0 %v1184_v56 }
  0xd1   : > { %1186 = vmatprep.subr.bf16.mxu0 %v1493_v0 }
  0xd4   : > { %1188 = vmatpush3.bf16.msra.mxu0 %v1187_v59 }
  0xd5   : > { %1189 = vmatprep.subr.bf16.mxu0 %v1493_v0 }
  0xd8   : > { %1191 = vmatpush3.bf16.msra.mxu0 %v1190_v62 }
  0xd9   : > { %1192 = vmatprep.subr.bf16.mxu0 %v1493_v0 }
  0xdc   : > { %1194 = vmatpush3.bf16.msra.mxu0 %v1193_v3 }
  0xdd   : > { %1195 = vmatprep.subr.bf16.mxu0 %v1493_v0 }
  0xe0   : > { %1197 = vmatpush3.bf16.msra.mxu0 %v1196_v6 }
  0xe1   : > { %1198 = vmatprep.subr.bf16.mxu0 %v1493_v0 }
  0xe4   : > { %1200 = vmatpush3.bf16.msra.mxu0 %v1199_v9 }
  0xe5   : > { %1201 = vmatprep.subr.bf16.mxu0 %v1493_v0 }
  0xe8   : > { %1203 = vmatpush3.bf16.msra.mxu0 %v1202_v15 }
 0x19d   : > { %v477_v10 = vpop.f32.mrb[0].mxu0 }
 0x19e   : > { %v481_v11 = vmax.f32 %v477_v10, 0.0  ;;  %v1026_v12 = vpop.f32.mrb[1].mxu0 }
 0x1a0   : > { %1060 = vmatmul.mubr.f32.vlgmr.msra.gmra.mrb[0].mxu1 %v481_v11 }
 0x1a1   : > { %1129 = vmatprep.mubr.msk.f32.mxu1 %vm1494_vm0, %v1495_v1  ;;  %v659_v1 = vld [vmem:[%s1875_s27 + $0x18] sm:$0xff]  ;;  %1206 = vmatpush3.bf16.msra.mxu1 %v1205_v19 }
 0x1a2   : > { %v1208_v20 = vpack.c.bf16 %v659_v1, %v658_v18  ;;  %1207 = vmatprep.subr.bf16.mxu1 %v1493_v0 }
 0x1a5   : > { %1209 = vmatpush3.bf16.msra.mxu1 %v1208_v20 }
 0x1a6   : > { %1210 = vmatprep.subr.bf16.mxu1 %v1493_v0 }
 0x1a9   : > { %1212 = vmatpush3.bf16.msra.mxu1 %v1211_v23 }
 0x1aa   : > { %1213 = vmatprep.subr.bf16.mxu1 %v1493_v0 }
 0x1ad   : > { %1215 = vmatpush3.bf16.msra.mxu1 %v1214_v26 }
 0x1ae   : > { %1216 = vmatprep.subr.bf16.mxu1 %v1493_v0 }
 0x1b1   : > { %1218 = vmatpush3.bf16.msra.mxu1 %v1217_v29 }
 0x1b2   : > { %1219 = vmatprep.subr.bf16.mxu1 %v1493_v0 }
 0x1b5   : > { %1221 = vmatpush3.bf16.msra.mxu1 %v1220_v32 }
 0x1b6   : > { %1222 = vmatprep.subr.bf16.mxu1 %v1493_v0 }
 0x1b9   : > { %1224 = vmatpush3.bf16.msra.mxu1 %v1223_v35 }
 0x1ba   : > { %1225 = vmatprep.subr.bf16.mxu1 %v1493_v0 }
 0x1bd   : > { %1227 = vmatpush3.bf16.msra.mxu1 %v1226_v41 }
 0x273   : > { %v564_v36 = vpop.f32.mrb[0].mxu1 }
 0x274   : > { %v568_v37 = vmax.f32 %v564_v36, 0.0  ;;  %v1061_v38 = vpop.f32.mrb[1].mxu1 }
 0x276   : > { %1095 = vmatmul.mubr.f32.vlgmr.msra.gmra.mrb[2].mxu0 %v568_v37 }
 0x349   : > { %v651_v42 = vpop.f32.mrb[2].mxu0 }
 0x34a   : > { %v655_v43 = vmax.f32 %v651_v42, 0.0  ;;  %v1096_v44 = vpop.f32.mrb[3].mxu0 }
 0x34c   : > { %1130 = vmatmul.mubr.f32.vlgmr.msra.gmra.mrb[2].mxu1 %v655_v43 }
 0x41f   : > { %v738_v0 = vpop.f32.mrb[2].mxu1 }
 0x420   : > { %742 = vst [vmem:[%s393_s13] sm:$0xff] %v738_v0  ;;  %v1131_v45 = vpop.f32.mrb[3].mxu1 }
 0x421 PF: > { %s1945_s8 = sld [smem:[#allocation13_spill]]  ;;  %p21_p1 = scmp.ge.s32.totalorder %s1548_s23, 4  }
 0x422   : > { %s1946_s18 = smov %s1476_s19  ;;  %s1947_s19 = smov %s1480_s20 }
 0x423   : > { %s1949_s21 = smov %s1548_s23  ;;  %23 = sbr.rel (!%p21_p1) target bundleno = 10 (0xa), region = 128 }
 0x427   : > { %s1948_s20 = smov %s1945_s8 }
 0x42a   :  { %762 = vsyncpa [#allocation3], 1 }
 0x42b   :  { %764 = vsyncpa [#allocation3 + $0x1], 1 }
 0x42c   :  { %765 = vsyncpa [#allocation5], 1 }
 0x42d   :  { %767 = vsyncpa [#allocation5 + $0x1], 1 }
 0x42e   :  { %768 = vsyncpa [#allocation8], 1 }
 0x42f   :  { %770 = vsyncpa [#allocation8 + $0x1], 1 }

</bundles_post_ra>
